<compile_context>
chip_gen: v7x
topology: tpu7x:2x2x1
jax: 0.10.0
libtpu: 0.0.40
codegen_flags: <defaults>
</compile_context>

<pallas_src>
import functools

import jax
import jax.numpy as jnp
from jax.experimental import pallas as pl
from jax.experimental.pallas import tpu as pltpu


def _round_up(x, m):
    return ((x + m - 1) // m) * m


def _ceil_div(a, b):
    return -(-a // b)


def _silu_f32(x):
    # x * sigmoid(x);  sigmoid(x) = 0.5 * (tanh(0.5*x) + 1)  -> single EUP op,
    # keeps VALU slots free (no divide, no exp+recip pair). Kept in f32.
    return x * (0.5 * jnp.tanh(0.5 * x) + 0.5)


def _fcnet_multibeta_kernel(segs, xin_ref, bfeat_ref, w_ref, b_ref,
                            wl_ref, bl_ref, o_ref):
    """Fused forward for one batch tile.

    segs: tuple of (row_start, row_count) into w_ref (bf16), in order:
      0: beta_embed Linear(3,H)       (rows padded to 16, cols padded to HP)
      1: beta_embed Linear(H,H)
      2: net Linear rows for cat([xts, ts])  (rows padded to mult of 16)
      3: W_fold = bew2 @ nw0_be  (folded beta_embed output path)
      4..: middle net Linear(H,H) layers
    b_ref (f32) rows: [beb0, beb1, b_n0_combined, b_mid_1, ...]
    wl_ref (bf16) / bl_ref (f32): final Linear(H, out) padded to (HP, OP)/(1, OP).
    """
    bf16 = jnp.bfloat16
    f32 = jnp.float32

    def wseg(k):
        s, n = segs[k]
        return w_ref[s:s + n, :]

    def bias(k):
        return b_ref[k:k + 1, :]

    # ---- beta_embed: Linear(3,H) -> SiLU -> Linear(H,H) -> SiLU
    # (the final Linear(H,1) is folded into wseg(3) / bias(2))
    h = jnp.dot(bfeat_ref[...], wseg(0), preferred_element_type=f32) + bias(0)
    h = _silu_f32(h).astype(bf16)
    h = jnp.dot(h, wseg(1), preferred_element_type=f32) + bias(1)
    h = _silu_f32(h).astype(bf16)

    # ---- net first layer on cat([xts, ts, beta_embed]) via split + fold
    g = (jnp.dot(xin_ref[...], wseg(2), preferred_element_type=f32)
         + jnp.dot(h, wseg(3), preferred_element_type=f32)
         + bias(2))
    g = _silu_f32(g).astype(bf16)

    # ---- middle hidden layers (SiLU after each)
    num_mid = len(segs) - 4
    for m in range(num_mid):
        g = jnp.dot(g, wseg(4 + m), preferred_element_type=f32) + bias(3 + m)
        g = _silu_f32(g).astype(bf16)

    # ---- final layer (no activation), lane-dense (OP = multiple of 128) store
    o_ref[...] = (jnp.dot(g, wl_ref[...], preferred_element_type=f32)
                  + bl_ref[...]).astype(o_ref.dtype)


def _linear_init(key, fan_in, fan_out):
    # PyTorch nn.Linear default init: U(-1/sqrt(fan_in), 1/sqrt(fan_in)).
    kw, kb = jax.random.split(key)
    bound = 1.0 / float(fan_in) ** 0.5
    w = jax.random.uniform(kw, (fan_in, fan_out), jnp.float32, -bound, bound)
    b = jax.random.uniform(kb, (1, fan_out), jnp.float32, -bound, bound)
    return w, b


def init_params(key, in_size, out_size, hidden_size, num_layers):
    sizes = [in_size + 2] + [hidden_size] * num_layers + [out_size]
    n_net = len(sizes) - 1
    keys = jax.random.split(key, n_net + 3)
    net_params = [_linear_init(keys[i], sizes[i], sizes[i + 1]) for i in range(n_net)]
    be_params = [_linear_init(keys[n_net + 0], 3, hidden_size),
                 _linear_init(keys[n_net + 1], hidden_size, hidden_size),
                 _linear_init(keys[n_net + 2], hidden_size, 1)]
    return net_params, be_params


def fcnet_multibeta_forward(x0s, xts, ts, beta0s, beta1s, net_params, be_params,
                            *, batch_tile=512):
    # NOTE: on v5e (1 vst slot, no bf16 VPU) batch_tile=256 may be preferable.
    del x0s  # unused in the PyTorch forward as well
    B, in_size = xts.shape
    num_layers = len(net_params) - 1
    assert num_layers >= 1  # TODO(synk): num_layers == 0 (no hidden layer) not handled
    hidden = net_params[0][0].shape[1]
    out_size = net_params[-1][0].shape[1]
    f32, bf16 = jnp.float32, jnp.bfloat16

    HP = _round_up(hidden, 128)          # lane-dense hidden width
    OP = _round_up(out_size, 128)        # lane-dense output width
    ROW = 16                             # bf16 packed-sublane unit: segment alignment
    K3 = ROW                             # cat([beta0, beta1, ts]) padded to 16
    KX = _round_up(in_size + 1, ROW)     # cat([xts, ts]) padded

    (bew0, beb0), (bew1, beb1), (bew2, beb2) = be_params
    nw0, nb0 = net_params[0]
    nw0_x = nw0[:in_size, :]
    nw0_t = nw0[in_size:in_size + 1, :]
    nw0_be = nw0[in_size + 1:in_size + 2, :]

    # Fold beta_embed's Linear(H,1) through the first net layer (exact reassoc):
    #   be @ nw0_be = h2 @ (bew2 @ nw0_be) + beb2 @ nw0_be
    w_fold = bew2 @ nw0_be                                   # (H, H)
    b_n0 = nb0 + beb2 @ nw0_be                               # (1, H)
    w_n0x = jnp.concatenate([nw0_x, nw0_t], axis=0)          # (in+1, H)

    def pad2(a, rows, cols, dtype):
        r, c = a.shape
        return jnp.pad(a.astype(f32), ((0, rows - r), (0, cols - c))).astype(dtype)

    # Weights in bf16 (MXU operands), biases kept in f32 (added post-accumulate).
    w_pieces = [pad2(bew0, K3, HP, bf16), pad2(bew1, HP, HP, bf16),
                pad2(w_n0x, KX, HP, bf16), pad2(w_fold, HP, HP, bf16)]
    b_pieces = [pad2(beb0, 1, HP, f32), pad2(beb1, 1, HP, f32), pad2(b_n0, 1, HP, f32)]
    for w, b in net_params[1:-1]:
        w_pieces.append(pad2(w, HP, HP, bf16))
        b_pieces.append(pad2(b, 1, HP, f32))

    segs, start = [], 0
    for w in w_pieces:
        segs.append((start, w.shape[0]))
        start += w.shape[0]
    w_stack = jnp.concatenate(w_pieces, axis=0)   # (total_rows, HP) bf16
    b_stack = jnp.concatenate(b_pieces, axis=0)   # (3 + num_mid, HP) f32
    w_last = pad2(net_params[-1][0], HP, OP, bf16)
    b_last = pad2(net_params[-1][1], 1, OP, f32)

    # ---- Batch tiling: size TM from a target step count (>=2 when batch allows,
    # so v7x can shard the "parallel" axis across both TCs), padding only to 8.
    B8 = _round_up(B, 8)
    n_steps = max(_ceil_div(B8, batch_tile), 2 if B8 >= 16 else 1)
    n_steps = min(n_steps, B8 // 8)
    TM = _round_up(_ceil_div(B8, n_steps), 8)
    grid_steps = _ceil_div(B8, TM)
    padB = grid_steps * TM

    def pad_act(a, cols):
        r, c = a.shape
        return jnp.pad(a.astype(f32), ((0, padB - r), (0, cols - c))).astype(bf16)

    xin = pad_act(jnp.concatenate([xts, ts], axis=1), KX)
    bfeat = pad_act(jnp.concatenate([beta0s, beta1s, ts], axis=1), K3)

    num_mid = num_layers - 1
    flops = 2 * padB * (K3 * HP + HP * HP + KX * HP + HP * HP
                        + num_mid * HP * HP + HP * OP)
    transc = padB * HP * (3 + num_mid)
    bytes_acc = (2 * (xin.size + bfeat.size + w_stack.size + w_last.size)
                 + 4 * (b_stack.size + b_last.size + padB * OP))

    # ---- VMEM budget from actual buffer sizes (weights single-buffered,
    # activation/output tiles double-buffered, plus intermediate headroom).
    weight_vmem = (2 * (w_stack.size + w_last.size)            # bf16
                   + 4 * (b_stack.size + b_last.size))         # f32
    act_vmem = 2 * (2 * TM * (KX + K3) + 4 * TM * OP)          # in/out tiles x2 buffers
    temp_vmem = 6 * 4 * TM * HP                                # f32/bf16 intermediates
    vmem_limit = int(min(64 << 20,
                         max(32 << 20, weight_vmem + act_vmem + temp_vmem + (4 << 20))))

    const = pl.Buffered(1)   # grid-invariant weights: no double-buffering needed
    kernel = functools.partial(_fcnet_multibeta_kernel, tuple(segs))
    out = pl.pallas_call(
        kernel,
        out_shape=jax.ShapeDtypeStruct((padB, OP), f32),
        grid=(grid_steps,),
        in_specs=[
            pl.BlockSpec((TM, KX), lambda i: (i, 0)),                      # cat([xts, ts])
            pl.BlockSpec((TM, K3), lambda i: (i, 0)),                      # cat([b0, b1, ts])
            pl.BlockSpec(w_stack.shape, lambda i: (0, 0), pipeline_mode=const),
            pl.BlockSpec(b_stack.shape, lambda i: (0, 0), pipeline_mode=const),
            pl.BlockSpec(w_last.shape, lambda i: (0, 0), pipeline_mode=const),
            pl.BlockSpec(b_last.shape, lambda i: (0, 0), pipeline_mode=const),
        ],
        out_specs=pl.BlockSpec((TM, OP), lambda i: (i, 0)),
        compiler_params=pltpu.CompilerParams(
            dimension_semantics=("parallel",),
            vmem_limit_bytes=vmem_limit,
        ),
        cost_estimate=pl.CostEstimate(
            flops=flops, transcendentals=transc, bytes_accessed=bytes_acc),
    )(xin, bfeat, w_stack, b_stack, w_last, b_last)

    return out[:B, :out_size]


def reference_forward(x0s, xts, ts, beta0s, beta1s, net_params, be_params):
    del x0s

    def lin(x, wb):
        w, b = wb
        return x @ w + b

    def silu(x):
        return x * (1.0 / (1.0 + jnp.exp(-x)))

    h = jnp.concatenate([beta0s, beta1s, ts], axis=1)
    h = silu(lin(h, be_params[0]))
    h = silu(lin(h, be_params[1]))
    be = lin(h, be_params[2])
    h = jnp.concatenate([xts, ts, be], axis=1)
    for i, wb in enumerate(net_params):
        h = lin(h, wb)
        if i != len(net_params) - 1:
            h = silu(h)
    return h


if __name__ == "__main__":
    B, in_size, out_size, hidden_size, num_layers = 8, 16, 16, 32, 2

    key = jax.random.PRNGKey(0)
    k1, k2, k3, k4, k5, kp = jax.random.split(key, 6)
    x0s = jax.random.normal(k1, (B, in_size), jnp.float32)
    xts = jax.random.normal(k2, (B, in_size), jnp.float32)
    ts = jax.random.uniform(k3, (B, 1), jnp.float32)
    beta0s = jax.random.uniform(k4, (B, 1), jnp.float32)
    beta1s = jax.random.uniform(k5, (B, 1), jnp.float32)

    net_params, be_params = init_params(kp, in_size, out_size, hidden_size, num_layers)

    out = fcnet_multibeta_forward(x0s, xts, ts, beta0s, beta1s, net_params, be_params)
    out = jax.block_until_ready(out)

    ref = reference_forward(x0s, xts, ts, beta0s, beta1s, net_params, be_params)
    assert out.shape == (B, out_size)
    # bf16 MXU operands (f32 accumulation): compare against the f32 reference
    # with a relaxed tolerance.
    assert jnp.allclose(out, ref, atol=3e-2, rtol=3e-2), "Pallas kernel mismatch vs reference"

    print("KERNEL_OK")
</pallas_src>

<mosaic_0001>
module attributes {stable_mosaic.version = 11 : i64} {
  func.func @_fcnet_multibeta_kernel(%arg0: i32, %arg1: memref<8x32xbf16, #tpu.memory_space<vmem>>, %arg2: memref<8x16xbf16, #tpu.memory_space<vmem>>, %arg3: memref<432x128xbf16, #tpu.memory_space<vmem>>, %arg4: memref<4x128xf32, #tpu.memory_space<vmem>>, %arg5: memref<128x128xbf16, #tpu.memory_space<vmem>>, %arg6: memref<1x128xf32, #tpu.memory_space<vmem>>, %arg7: memref<8x128xf32, #tpu.memory_space<vmem>>) attributes {dimension_semantics = [#tpu.dimension_semantics<parallel>], iteration_bounds = array<i64: 1>, scalar_prefetch = 0 : i64, scratch_operands = 0 : i64, tpu.core_type = #tpu.core_type<tc>, window_params = [{transform_indices = @transform_0, window_bounds = array<i64: 8, 32>}, {transform_indices = @transform_1, window_bounds = array<i64: 8, 16>}, {pipeline_mode = #tpu.pipeline_mode<synchronous>, transform_indices = @transform_2, window_bounds = array<i64: 432, 128>}, {pipeline_mode = #tpu.pipeline_mode<synchronous>, transform_indices = @transform_3, window_bounds = array<i64: 4, 128>}, {pipeline_mode = #tpu.pipeline_mode<synchronous>, transform_indices = @transform_4, window_bounds = array<i64: 128, 128>}, {pipeline_mode = #tpu.pipeline_mode<synchronous>, transform_indices = @transform_5, window_bounds = array<i64: 1, 128>}, {transform_indices = @transform_6, window_bounds = array<i64: 8, 128>}]} {
    %c0 = arith.constant 0 : index
    %c0_0 = arith.constant 0 : index
    %0 = vector.load %arg2[%c0, %c0_0] : memref<8x16xbf16, #tpu.memory_space<vmem>>, vector<8x16xbf16>
    %c0_1 = arith.constant 0 : index
    %c0_2 = arith.constant 0 : index
    %1 = vector.load %arg3[%c0_1, %c0_2] : memref<432x128xbf16, #tpu.memory_space<vmem>>, vector<16x128xbf16>
    %cst = arith.constant dense<0.000000e+00> : vector<8x128xf32>
    %2 = tpu.matmul %0, %1, %cst {dimension_numbers = #tpu.dot_dimension_numbers<[1], [0], [0], [1], [0, 0, 1, 1], [], []>} : vector<8x16xbf16>, vector<16x128xbf16>, vector<8x128xf32> -> vector<8x128xf32>
    %c0_3 = arith.constant 0 : index
    %c0_4 = arith.constant 0 : index
    %3 = vector.load %arg4[%c0_3, %c0_4] : memref<4x128xf32, #tpu.memory_space<vmem>>, vector<1x128xf32>
    %4 = vector.broadcast %3 : vector<1x128xf32> to vector<8x128xf32>
    %5 = arith.addf %2, %4 : vector<8x128xf32>
    %cst_5 = arith.constant 5.000000e-01 : f32
    %6 = vector.broadcast %cst_5 : f32 to vector<8x128xf32>
    %7 = arith.mulf %6, %5 : vector<8x128xf32>
    %8 = math.tanh %7 : vector<8x128xf32>
    %cst_6 = arith.constant 5.000000e-01 : f32
    %9 = vector.broadcast %cst_6 : f32 to vector<8x128xf32>
    %10 = arith.mulf %9, %8 : vector<8x128xf32>
    %cst_7 = arith.constant 5.000000e-01 : f32
    %11 = vector.broadcast %cst_7 : f32 to vector<8x128xf32>
    %12 = arith.addf %10, %11 : vector<8x128xf32>
    %13 = arith.mulf %5, %12 : vector<8x128xf32>
    %14 = arith.truncf %13 : vector<8x128xf32> to vector<8x128xbf16>
    %c16 = arith.constant 16 : index
    %c0_8 = arith.constant 0 : index
    %15 = vector.load %arg3[%c16, %c0_8] : memref<432x128xbf16, #tpu.memory_space<vmem>>, vector<128x128xbf16>
    %cst_9 = arith.constant dense<0.000000e+00> : vector<8x128xf32>
    %16 = tpu.matmul %14, %15, %cst_9 {dimension_numbers = #tpu.dot_dimension_numbers<[1], [0], [0], [1], [0, 0, 1, 1], [], []>} : vector<8x128xbf16>, vector<128x128xbf16>, vector<8x128xf32> -> vector<8x128xf32>
    %c1 = arith.constant 1 : index
    %c0_10 = arith.constant 0 : index
    %17 = vector.load %arg4[%c1, %c0_10] : memref<4x128xf32, #tpu.memory_space<vmem>>, vector<1x128xf32>
    %18 = vector.broadcast %17 : vector<1x128xf32> to vector<8x128xf32>
    %19 = arith.addf %16, %18 : vector<8x128xf32>
    %cst_11 = arith.constant 5.000000e-01 : f32
    %20 = vector.broadcast %cst_11 : f32 to vector<8x128xf32>
    %21 = arith.mulf %20, %19 : vector<8x128xf32>
    %22 = math.tanh %21 : vector<8x128xf32>
    %cst_12 = arith.constant 5.000000e-01 : f32
    %23 = vector.broadcast %cst_12 : f32 to vector<8x128xf32>
    %24 = arith.mulf %23, %22 : vector<8x128xf32>
    %cst_13 = arith.constant 5.000000e-01 : f32
    %25 = vector.broadcast %cst_13 : f32 to vector<8x128xf32>
    %26 = arith.addf %24, %25 : vector<8x128xf32>
    %27 = arith.mulf %19, %26 : vector<8x128xf32>
    %28 = arith.truncf %27 : vector<8x128xf32> to vector<8x128xbf16>
    %c0_14 = arith.constant 0 : index
    %c0_15 = arith.constant 0 : index
    %29 = vector.load %arg1[%c0_14, %c0_15] : memref<8x32xbf16, #tpu.memory_space<vmem>>, vector<8x32xbf16>
    %c144 = arith.constant 144 : index
    %c0_16 = arith.constant 0 : index
    %30 = vector.load %arg3[%c144, %c0_16] : memref<432x128xbf16, #tpu.memory_space<vmem>>, vector<32x128xbf16>
    %cst_17 = arith.constant dense<0.000000e+00> : vector<8x128xf32>
    %31 = tpu.matmul %29, %30, %cst_17 {dimension_numbers = #tpu.dot_dimension_numbers<[1], [0], [0], [1], [0, 0, 1, 1], [], []>} : vector<8x32xbf16>, vector<32x128xbf16>, vector<8x128xf32> -> vector<8x128xf32>
    %c176 = arith.constant 176 : index
    %c0_18 = arith.constant 0 : index
    %32 = vector.load %arg3[%c176, %c0_18] : memref<432x128xbf16, #tpu.memory_space<vmem>>, vector<128x128xbf16>
    %cst_19 = arith.constant dense<0.000000e+00> : vector<8x128xf32>
    %33 = tpu.matmul %28, %32, %cst_19 {dimension_numbers = #tpu.dot_dimension_numbers<[1], [0], [0], [1], [0, 0, 1, 1], [], []>} : vector<8x128xbf16>, vector<128x128xbf16>, vector<8x128xf32> -> vector<8x128xf32>
    %34 = arith.addf %31, %33 : vector<8x128xf32>
    %c2 = arith.constant 2 : index
    %c0_20 = arith.constant 0 : index
    %35 = vector.load %arg4[%c2, %c0_20] : memref<4x128xf32, #tpu.memory_space<vmem>>, vector<1x128xf32>
    %36 = vector.broadcast %35 : vector<1x128xf32> to vector<8x128xf32>
    %37 = arith.addf %34, %36 : vector<8x128xf32>
    %cst_21 = arith.constant 5.000000e-01 : f32
    %38 = vector.broadcast %cst_21 : f32 to vector<8x128xf32>
    %39 = arith.mulf %38, %37 : vector<8x128xf32>
    %40 = math.tanh %39 : vector<8x128xf32>
    %cst_22 = arith.constant 5.000000e-01 : f32
    %41 = vector.broadcast %cst_22 : f32 to vector<8x128xf32>
    %42 = arith.mulf %41, %40 : vector<8x128xf32>
    %cst_23 = arith.constant 5.000000e-01 : f32
    %43 = vector.broadcast %cst_23 : f32 to vector<8x128xf32>
    %44 = arith.addf %42, %43 : vector<8x128xf32>
    %45 = arith.mulf %37, %44 : vector<8x128xf32>
    %46 = arith.truncf %45 : vector<8x128xf32> to vector<8x128xbf16>
    %c304 = arith.constant 304 : index
    %c0_24 = arith.constant 0 : index
    %47 = vector.load %arg3[%c304, %c0_24] : memref<432x128xbf16, #tpu.memory_space<vmem>>, vector<128x128xbf16>
    %cst_25 = arith.constant dense<0.000000e+00> : vector<8x128xf32>
    %48 = tpu.matmul %46, %47, %cst_25 {dimension_numbers = #tpu.dot_dimension_numbers<[1], [0], [0], [1], [0, 0, 1, 1], [], []>} : vector<8x128xbf16>, vector<128x128xbf16>, vector<8x128xf32> -> vector<8x128xf32>
    %c3 = arith.constant 3 : index
    %c0_26 = arith.constant 0 : index
    %49 = vector.load %arg4[%c3, %c0_26] : memref<4x128xf32, #tpu.memory_space<vmem>>, vector<1x128xf32>
    %50 = vector.broadcast %49 : vector<1x128xf32> to vector<8x128xf32>
    %51 = arith.addf %48, %50 : vector<8x128xf32>
    %cst_27 = arith.constant 5.000000e-01 : f32
    %52 = vector.broadcast %cst_27 : f32 to vector<8x128xf32>
    %53 = arith.mulf %52, %51 : vector<8x128xf32>
    %54 = math.tanh %53 : vector<8x128xf32>
    %cst_28 = arith.constant 5.000000e-01 : f32
    %55 = vector.broadcast %cst_28 : f32 to vector<8x128xf32>
    %56 = arith.mulf %55, %54 : vector<8x128xf32>
    %cst_29 = arith.constant 5.000000e-01 : f32
    %57 = vector.broadcast %cst_29 : f32 to vector<8x128xf32>
    %58 = arith.addf %56, %57 : vector<8x128xf32>
    %59 = arith.mulf %51, %58 : vector<8x128xf32>
    %60 = arith.truncf %59 : vector<8x128xf32> to vector<8x128xbf16>
    %c0_30 = arith.constant 0 : index
    %c0_31 = arith.constant 0 : index
    %61 = vector.load %arg5[%c0_30, %c0_31] : memref<128x128xbf16, #tpu.memory_space<vmem>>, vector<128x128xbf16>
    %cst_32 = arith.constant dense<0.000000e+00> : vector<8x128xf32>
    %62 = tpu.matmul %60, %61, %cst_32 {dimension_numbers = #tpu.dot_dimension_numbers<[1], [0], [0], [1], [0, 0, 1, 1], [], []>} : vector<8x128xbf16>, vector<128x128xbf16>, vector<8x128xf32> -> vector<8x128xf32>
    %c0_33 = arith.constant 0 : index
    %c0_34 = arith.constant 0 : index
    %63 = vector.load %arg6[%c0_33, %c0_34] : memref<1x128xf32, #tpu.memory_space<vmem>>, vector<1x128xf32>
    %64 = vector.broadcast %63 : vector<1x128xf32> to vector<8x128xf32>
    %65 = arith.addf %62, %64 : vector<8x128xf32>
    %c0_35 = arith.constant 0 : index
    %c0_36 = arith.constant 0 : index
    %66 = vector.load %arg7[%c0_35, %c0_36] : memref<8x128xf32, #tpu.memory_space<vmem>>, vector<8x128xf32>
    tpu.vector_store %arg7[%c0_35, %c0_36], %65 {strides = array<i32>} : memref<8x128xf32, #tpu.memory_space<vmem>>, vector<8x128xf32>,
    return
  }
  func.func @transform_0(%arg0: i32) -> (i32, i32) {
    %c0_i32 = arith.constant 0 : i32
    %c0_i32_0 = arith.constant 0 : i32
    return %arg0, %c0_i32 : i32, i32
  }
  func.func @transform_1(%arg0: i32) -> (i32, i32) {
    %c0_i32 = arith.constant 0 : i32
    %c0_i32_0 = arith.constant 0 : i32
    return %arg0, %c0_i32 : i32, i32
  }
  func.func @transform_2(%arg0: i32) -> (i32, i32) {
    %c0_i32 = arith.constant 0 : i32
    %c0_i32_0 = arith.constant 0 : i32
    %c0_i32_1 = arith.constant 0 : i32
    return %c0_i32, %c0_i32_0 : i32, i32
  }
  func.func @transform_3(%arg0: i32) -> (i32, i32) {
    %c0_i32 = arith.constant 0 : i32
    %c0_i32_0 = arith.constant 0 : i32
    %c0_i32_1 = arith.constant 0 : i32
    return %c0_i32, %c0_i32_0 : i32, i32
  }
  func.func @transform_4(%arg0: i32) -> (i32, i32) {
    %c0_i32 = arith.constant 0 : i32
    %c0_i32_0 = arith.constant 0 : i32
    %c0_i32_1 = arith.constant 0 : i32
    return %c0_i32, %c0_i32_0 : i32, i32
  }
  func.func @transform_5(%arg0: i32) -> (i32, i32) {
    %c0_i32 = arith.constant 0 : i32
    %c0_i32_0 = arith.constant 0 : i32
    %c0_i32_1 = arith.constant 0 : i32
    return %c0_i32, %c0_i32_0 : i32, i32
  }
  func.func @transform_6(%arg0: i32) -> (i32, i32) {
    %c0_i32 = arith.constant 0 : i32
    %c0_i32_0 = arith.constant 0 : i32
    return %arg0, %c0_i32 : i32, i32
  }
}

</mosaic_0001>

<bundles_post_ra>
// kernel: tpu_custom_call.1
= control target key start
LH: loop header
LB: loop body
LE: loop exit
PB: predicated region body
PF: predicated region fallthrough
CT: control target
= control target key end

     0   :  { %11 = vsyncpa [#allocation3], 0  ;;  %s1189_s0 = inlined_call_operand.hbm [shape: bf16[8,32], index: 0, kind: input, shape index: {}]   ;;  %s1190_s1 = inlined_call_operand.hbm [shape: bf16[8,16], index: 1, kind: input, shape index: {}]   ;;  %s1191_s2 = inlined_call_operand.hbm [shape: bf16[432,128], index: 2, kind: input, shape index: {}]   ;;  %s1192_s3 = inlined_call_operand.vmem [shape: f32[4,128], index: 3, kind: input, shape index: {}]   ;;  %s1193_s4 = inlined_call_operand.hbm [shape: bf16[128,128], index: 4, kind: input, shape index: {}]   ;;  %s1194_s5 = inlined_call_operand.vmem [shape: f32[1,128], index: 5, kind: input, shape index: {}]   ;;  %s1195_s6 = inlined_call_operand.hbm [shape: f32[8,128], index: 6, kind: output, shape index: {}]  }
   0x1   :  { %12 = vsyncpa [#allocation6], 0 }
   0x2   :  { %13 = vsyncpa [#allocation9], 0 }
   0x3   :  { %14 = vsyncpa [#allocation4], 0  ;;  %s1023_s21 = smov [#allocation5]   ;;  %s1024_s23 = smov [#allocation2]  }
   0x4   :  { %s31_s22 = sshll.u32 %s1023_s21, 4  ;;  %s21_s24 = sshll.u32 %s1024_s23, 4  ;;  %s32_s22 = int_to_ptr.vmem [resolvable:$true] %s31_s22  ;;  %s22_s24 = int_to_ptr.vmem [resolvable:$true] %s21_s24 }
   0x5   :  { %s905_s27 = scalar_lea.hbm %s1190_s1, 64 }
   0x6   :  { %p906_p0 = scmp.ne.s32.totalorder %s1190_s1, %s905_s27  ;;  %p909_p1 = scmp.lt.u32.totalorder %s905_s27, %s1190_s1 }
   0x8   :  { %p911_p2 = pnand %p909_p1, %p906_p0 }
   0xa   :  { %914 = shalt.err (!%p911_p2)
}
   0xb   :  { %s915_s8 = scalar_lea.vmem %s32_s22, 64  ;;  %p920_p4 = scmp.lt.s32.totalorder %s32_s22, %s32_s22 }
   0xc   :  { %p916_p3 = scmp.ne.s32.totalorder %s32_s22, %s915_s8  ;;  %p921_p5 = scmp.lt.s32.totalorder %s915_s8, %s915_s8 }
   0xe   :  { %p922_p6 = por %p921_p5, %p920_p4 }
  0x10   :  { %p923_p7 = pnand %p922_p6, %p916_p3 }
  0x12   :  { %926 = shalt.err (!%p923_p7)
}
  0x13   :  { %34 = dma.hbm_to_vmem [thread:$0]  %s1190_s1, 64, %s32_s22, [#allocation6]  }
  0x14   :  { %s927_s13 = scalar_lea.hbm %s1189_s0, 64 }
  0x15   :  { %p928_p8 = scmp.ne.s32.totalorder %s1189_s0, %s927_s13  ;;  %p931_p9 = scmp.lt.u32.totalorder %s927_s13, %s1189_s0 }
  0x17   :  { %p933_p10 = pnand %p931_p9, %p928_p8 }
  0x19   :  { %936 = shalt.err (!%p933_p10)
}
  0x1a   :  { %s937_s18 = scalar_lea.vmem %s22_s24, 64  ;;  %p942_p12 = scmp.lt.s32.totalorder %s22_s24, %s22_s24 }
  0x1b   :  { %p938_p11 = scmp.ne.s32.totalorder %s22_s24, %s937_s18  ;;  %p943_p13 = scmp.lt.s32.totalorder %s937_s18, %s937_s18 }
  0x1d   :  { %p944_p0 = por %p943_p13, %p942_p12 }
  0x1f   :  { %p945_p1 = pnand %p944_p0, %p938_p11 }
  0x21   :  { %948 = shalt.err (!%p945_p1)
}
  0x22   :  { %24 = dma.hbm_to_vmem [thread:$0]  %s1189_s0, 64, %s22_s24, [#allocation3]  }
  0x23   :  { %s1025_s20 = smov [#allocation7]   ;;  %s949_s25 = scalar_lea.hbm %s1191_s2, 3456 }
  0x24   :  { %s40_s21 = sshll.u32 %s1025_s20, 4  ;;  %p950_p2 = scmp.ne.s32.totalorder %s1191_s2, %s949_s25  ;;  %s41_s21 = int_to_ptr.vmem [resolvable:$true] %s40_s21 }
  0x25   :  { %p953_p3 = scmp.lt.u32.totalorder %s949_s25, %s1191_s2 }
  0x27   :  { %p955_p4 = pnand %p953_p3, %p950_p2 }
  0x29   :  { %958 = shalt.err (!%p955_p4)
}
  0x2a   :  { %s959_s30 = scalar_lea.vmem %s41_s21, 3456  ;;  %p964_p6 = scmp.lt.s32.totalorder %s41_s21, %s41_s21 }
  0x2b   :  { %p960_p5 = scmp.ne.s32.totalorder %s41_s21, %s959_s30  ;;  %p965_p7 = scmp.lt.s32.totalorder %s959_s30, %s959_s30 }
  0x2d   :  { %p966_p8 = por %p965_p7, %p964_p6 }
  0x2f   :  { %p967_p9 = pnand %p966_p8, %p960_p5 }
  0x31   :  { %970 = shalt.err (!%p967_p9)
}
  0x32   :  { %s1026_s0 = smov 64   ;;  %s1027_s24 = smov 4  }
  0x33   :  { %46 = dma.hbm_to_vmem [thread:$0]  %s1191_s2, 3456, %s41_s21, [#allocation6], %s1026_s0, %s1026_s0, %s1027_s24  }
  0x34   :  { %s1028_s9 = smov [#allocation8]   ;;  %s971_s13 = scalar_lea.hbm %s1193_s4, 1024 }
  0x35   :  { %s54_s10 = sshll.u32 %s1028_s9, 4  ;;  %p972_p10 = scmp.ne.s32.totalorder %s1193_s4, %s971_s13  ;;  %s55_s10 = int_to_ptr.vmem [resolvable:$true] %s54_s10 }
  0x36   :  { %p975_p11 = scmp.lt.u32.totalorder %s971_s13, %s1193_s4 }
  0x38   :  { %p977_p12 = pnand %p975_p11, %p972_p10 }
  0x3a   :  { %980 = shalt.err (!%p977_p12)
}
  0x3b   :  { %s981_s18 = scalar_lea.vmem %s55_s10, 1024  ;;  %p986_p0 = scmp.lt.s32.totalorder %s55_s10, %s55_s10 }
  0x3c   :  { %p982_p13 = scmp.ne.s32.totalorder %s55_s10, %s981_s18  ;;  %p987_p1 = scmp.lt.s32.totalorder %s981_s18, %s981_s18 }
  0x3e   :  { %p988_p2 = por %p987_p1, %p986_p0 }
  0x40   :  { %p989_p3 = pnand %p988_p2, %p982_p13 }
  0x42   :  { %992 = shalt.err (!%p989_p3)
}
  0x43   :  { %60 = dma.hbm_to_vmem [thread:$0]  %s1193_s4, 1024, %s55_s10, [#allocation9], %s1026_s0, %s1026_s0, %s1027_s24  }
  0x44   :  { %1015 = dma.done.wait [#allocation3], 64  }
  0x45   :  { %1016 = vsyncadd [#allocation3], 4294967232 }
  0x46   :  { %1017 = dma.done.wait [#allocation6], 3520  }
  0x47   :  { %1018 = vsyncadd [#allocation6], 4294963776 }
  0x48   :  { %1019 = dma.done.wait [#allocation9], 1024  }
  0x49   :  { %1020 = vsyncadd [#allocation9], 4294966272  ;;  %v1029_v0 = vmov 0.0   ;;  %vm1030_vm0 = vmmov 0   ;;  %v862_v1 = vld [vmem:[#allocation7] sm:$0xff]   ;;  %vm90_vm1 = vcmask 130048  }
  0x4a   :  { %759 = vmatprep.subr.bf16.mxu0 %v1029_v0  ;;  %761 = vmatprep.mubr.msk.bf16.mxu0 %vm1030_vm0, %v1029_v0  ;;  %v76_v2 = vld [vmem:[#allocation5] sm:$0xf]  ;;  %v863_v3 = vld [vmem:[#allocation7 + $0x8] sm:$0xff]   ;;  %v864_v4 = vld [vmem:[#allocation7 + $0x10] sm:$0xff]   ;;  %vm376_vm2 = vcmask 261120   ;;  %s1031_s29 = smov [#allocation10]  }
  0x4b   :  { %765 = vmatprep.subr.bf16.mxu1 %v1029_v0  ;;  %781 = vmatprep.mubr.msk.bf16.mxu1 %vm1030_vm0, %v1029_v0  ;;  %v865_v5 = vld [vmem:[#allocation7 + $0x18] sm:$0xff]   ;;  %v866_v6 = vld [vmem:[#allocation7 + $0x20] sm:$0xff]   ;;  %v867_v7 = vld [vmem:[#allocation7 + $0x28] sm:$0xff]   ;;  %s665_s30 = sshll.u32 %s1031_s29, 4  ;;  %s666_s30 = int_to_ptr.vmem [resolvable:$true] %s665_s30 }
  0x4c   :  { %760 = vmatpush3.bf16.msra.mxu0 %v862_v1  ;;  %766 = vmatpush3.bf16.msra.mxu1 %v863_v3  ;;  %v868_v8 = vld [vmem:[#allocation7 + $0x30] sm:$0xff]   ;;  %v869_v9 = vld [vmem:[#allocation7 + $0x38] sm:$0xff]   ;;  %v870_v10 = vld [vmem:[#allocation7 + $0x40] sm:$0xff]   ;;  %p998_p5 = scmp.lt.s32.totalorder %s666_s30, %s666_s30 }
  0x4d   :  { %785 = vmatprep.subr.bf16.mxu0 %v1029_v0  ;;  %767 = vmatprep.subr.bf16.mxu1 %v1029_v0  ;;  %v871_v11 = vld [vmem:[#allocation7 + $0x58] sm:$0xff]   ;;  %v872_v12 = vld [vmem:[#allocation7 + $0x60] sm:$0xff]   ;;  %v873_v25 = vld [vmem:[#allocation7 + $0x68] sm:$0xff]  }
  0x4e   :  { %v676_v13 = vld [vmem:[%s1192_s3] ss:$0 sm:$0xff]  ;;  %v874_v26 = vld [vmem:[#allocation7 + $0x70] sm:$0xff]   ;;  %v876_v28 = vld [vmem:[#allocation7 + $0x80] sm:$0xff]  }
  0x4f   :  { %762 = vmatmul.mubr.msk.bf16.vlgmr.msra.gmra.mrb[0].mxu0 %vm90_vm1, %v76_v2  ;;  %v875_v27 = vld [vmem:[#allocation7 + $0x78] sm:$0xff]   ;;  %v877_v29 = vld [vmem:[#allocation7 + $0x48] sm:$0xff]   ;;  %v879_v31 = vld [vmem:[#allocation7 + $0x50] sm:$0xff]  }
  0x50   :  { %801 = vmatprep.mubr.msk.bf16.mxu0 %vm1030_vm0, %v1029_v0  ;;  %768 = vmatpush3.bf16.msra.mxu1 %v864_v4  ;;  %v878_v30 = vld [vmem:[#allocation7 + $0x88] sm:$0xff]   ;;  %v880_v32 = vld [vmem:[#allocation7 + $0x90] sm:$0xff]   ;;  %v255_v33 = vld [vmem:[#allocation2] sm:$0xf] }
  0x51   :  { %769 = vmatprep.subr.bf16.mxu1 %v1029_v0  ;;  %786 = vmatpush3.bf16.msra.mxu0 %v871_v11  ;;  %v679_v34 = vld [vmem:[%s1192_s3 + $0x1] ss:$0 sm:$0xff]  ;;  %v882_v47 = vld [vmem:[#allocation7 + $0xa0] sm:$0xff]   ;;  %v883_v52 = vld [vmem:[#allocation7 + $0xa8] sm:$0xff]  }
  0x52   :  { %787 = vmatprep.subr.bf16.mxu0 %v1029_v0  ;;  %v881_v45 = vld [vmem:[#allocation7 + $0x98] sm:$0xff]   ;;  %v884_v53 = vld [vmem:[#allocation7 + $0xb0] sm:$0xff]   ;;  %v886_v55 = vld [vmem:[#allocation7 + $0xc0] sm:$0xff]  }
  0x53   :  { %v885_v54 = vld [vmem:[#allocation7 + $0xb8] sm:$0xff]   ;;  %v887_v56 = vld [vmem:[#allocation7 + $0xc8] sm:$0xff]   ;;  %v888_v57 = vld [vmem:[#allocation7 + $0xd0] sm:$0xff]  }
  0x54   :  { %770 = vmatpush3.bf16.msra.mxu1 %v865_v5  ;;  %v889_v58 = vld [vmem:[#allocation8] sm:$0xff]   ;;  %v890_v59 = vld [vmem:[#allocation8 + $0x8] sm:$0xff]   ;;  %v892_v11 = vld [vmem:[#allocation8 + $0x18] sm:$0xff]  }
  0x55   :  { %771 = vmatprep.subr.bf16.mxu1 %v1029_v0  ;;  %788 = vmatpush3.bf16.msra.mxu0 %v872_v12  ;;  %v699_v61 = vld [vmem:[%s1192_s3 + $0x2] ss:$0 sm:$0xff] }
  0x56   :  { %789 = vmatprep.subr.bf16.mxu0 %v1029_v0  ;;  %v893_v12 = vld [vmem:[#allocation8 + $0x20] sm:$0xff]  }
  0x58   :  { %772 = vmatpush3.bf16.msra.mxu1 %v866_v6 }
  0x59   :  { %773 = vmatprep.subr.bf16.mxu1 %v1029_v0  ;;  %790 = vmatpush3.bf16.msra.mxu0 %v873_v25 }
  0x5a   :  { %791 = vmatprep.subr.bf16.mxu0 %v1029_v0 }
  0x5c   :  { %774 = vmatpush3.bf16.msra.mxu1 %v867_v7 }
  0x5d   :  { %775 = vmatprep.subr.bf16.mxu1 %v1029_v0  ;;  %792 = vmatpush3.bf16.msra.mxu0 %v874_v26 }
  0x5e   :  { %793 = vmatprep.subr.bf16.mxu0 %v1029_v0 }
  0x60   :  { %776 = vmatpush3.bf16.msra.mxu1 %v868_v8 }
  0x61   :  { %777 = vmatprep.subr.bf16.mxu1 %v1029_v0  ;;  %794 = vmatpush3.bf16.msra.mxu0 %v875_v27 }
  0x62   :  { %795 = vmatprep.subr.bf16.mxu0 %v1029_v0 }
  0x64   :  { %778 = vmatpush3.bf16.msra.mxu1 %v869_v9 }
  0x65   :  { %779 = vmatprep.subr.bf16.mxu1 %v1029_v0  ;;  %796 = vmatpush3.bf16.msra.mxu0 %v876_v28 }
  0x66   :  { %797 = vmatprep.subr.bf16.mxu0 %v1029_v0 }
  0x68   :  { %780 = vmatpush3.bf16.msra.mxu1 %v870_v10  ;;  %v891_v10 = vld [vmem:[#allocation8 + $0x10] sm:$0xff]  }
  0x69   :  { %805 = vmatprep.subr.bf16.mxu1 %v1029_v0  ;;  %798 = vmatpush3.bf16.msra.mxu0 %v878_v30 }
  0x6a   :  { %799 = vmatprep.subr.bf16.mxu0 %v1029_v0 }
  0x6d   :  { %800 = vmatpush3.bf16.msra.mxu0 %v880_v32 }
  0x6e   :  { %813 = vmatprep.subr.bf16.mxu0 %v1029_v0 }
 0x122   :  { %v128_v14 = vpop.f32.mrb[0].mxu0 }
 0x123   :  { %v129_v15 = vadd.f32 %v676_v13, %v128_v14  ;;  %v763_v16 = vpop.f32.mrb[1].mxu0  ;;  %v894_v13 = vld [vmem:[#allocation8 + $0x28] sm:$0xff]   ;;  %v895_v14 = vld [vmem:[#allocation8 + $0x30] sm:$0xff]  }
 0x124   :  { %v131_v17 = vpop.f32.mrb[2].mxu0  ;;  %v700_v16 = vld [vmem:[%s1192_s3 + $0x3] ss:$0 sm:$0xff]  ;;  %s993_s3 = scalar_lea.vmem %s666_s30, 128 }
 0x125   :  { %v134_v18 = vmul.f32 0.5, %v129_v15  ;;  %v764_v19 = vpop.f32.mrb[3].mxu0  ;;  %p994_p4 = scmp.ne.s32.totalorder %s666_s30, %s993_s3  ;;  %p999_p6 = scmp.lt.s32.totalorder %s993_s3, %s993_s3 }
 0x127   :  { %897 = vtanh.f32 %v134_v18  ;;  %p1000_p7 = por %p999_p6, %p998_p5 }
 0x129   :  { %p1001_p8 = pnand %p1000_p7, %p994_p4 }
 0x131   :  { %v898_v20 = vpop.eup %897 }
 0x132   :  { %v136_v21 = vmul.f32 0.5, %v898_v20 }
 0x134   :  { %v137_v22 = vadd.f32 0.5, %v136_v21 }
 0x136   :  { %v138_v23 = vmul.f32 %v137_v22, %v129_v15  ;;  %v896_v15 = vld [vmem:[#allocation8 + $0x38] sm:$0xff]  }
 0x138   :  { %v139_v24 = vpack.c.bf16 %v138_v23, %v138_v23 }
 0x13a   :  { %782 = vmatmul.mubr.bf16.vlgmr.msra.gmra.mrb[0].mxu1 %v139_v24 }
 0x13b   :  { %809 = vmatprep.mubr.msk.bf16.mxu1 %vm1030_vm0, %v1029_v0  ;;  %806 = vmatpush3.bf16.msra.mxu1 %v877_v29 }
 0x13c   :  { %807 = vmatprep.subr.bf16.mxu1 %v1029_v0 }
 0x13f   :  { %808 = vmatpush3.bf16.msra.mxu1 %v879_v31 }
 0x140   :  { %833 = vmatprep.subr.bf16.mxu1 %v1029_v0 }
 0x142   :  { %810 = vmatmul.mubr.msk.bf16.vlgmr.msra.gmra.mrb[4].mxu1 %vm376_vm2, %v255_v33 }
 0x143   :  { %849 = vmatprep.mubr.msk.bf16.mxu1 %vm1030_vm0, %v1029_v0  ;;  %834 = vmatpush3.bf16.msra.mxu1 %v889_v58 }
 0x144   :  { %835 = vmatprep.subr.bf16.mxu1 %v1029_v0 }
 0x147   :  { %836 = vmatpush3.bf16.msra.mxu1 %v890_v59 }
 0x148   :  { %837 = vmatprep.subr.bf16.mxu1 %v1029_v0 }
 0x14b   :  { %838 = vmatpush3.bf16.msra.mxu1 %v891_v10 }
 0x14c   :  { %839 = vmatprep.subr.bf16.mxu1 %v1029_v0 }
 0x14f   :  { %840 = vmatpush3.bf16.msra.mxu1 %v892_v11 }
 0x150   :  { %841 = vmatprep.subr.bf16.mxu1 %v1029_v0 }
 0x153   :  { %842 = vmatpush3.bf16.msra.mxu1 %v893_v12 }
 0x154   :  { %843 = vmatprep.subr.bf16.mxu1 %v1029_v0 }
 0x157   :  { %844 = vmatpush3.bf16.msra.mxu1 %v894_v13 }
 0x158   :  { %845 = vmatprep.subr.bf16.mxu1 %v1029_v0 }
 0x15b   :  { %846 = vmatpush3.bf16.msra.mxu1 %v895_v14 }
 0x15c   :  { %847 = vmatprep.subr.bf16.mxu1 %v1029_v0 }
 0x15f   :  { %848 = vmatpush3.bf16.msra.mxu1 %v896_v15 }
 0x20d   :  { %v243_v35 = vpop.f32.mrb[0].mxu1 }
 0x20e   :  { %v244_v36 = vadd.f32 %v679_v34, %v243_v35  ;;  %v783_v37 = vpop.f32.mrb[1].mxu1 }
 0x20f   :  { %v246_v38 = vpop.f32.mrb[2].mxu1 }
 0x210   :  { %v249_v39 = vmul.f32 0.5, %v244_v36  ;;  %v784_v40 = vpop.f32.mrb[3].mxu1 }
 0x212   :  { %899 = vtanh.f32 %v249_v39 }
 0x215   :  { %v414_v48 = vpop.f32.mrb[4].mxu1 }
 0x216   :  { %v811_v49 = vpop.f32.mrb[5].mxu1 }
 0x217   :  { %v417_v50 = vpop.f32.mrb[6].mxu1 }
 0x218   :  { %v812_v51 = vpop.f32.mrb[7].mxu1 }
 0x21c   :  { %v900_v41 = vpop.eup %899 }
 0x21d   :  { %v251_v42 = vmul.f32 0.5, %v900_v41 }
 0x21f   :  { %v252_v43 = vadd.f32 0.5, %v251_v42 }
 0x221   :  { %v253_v44 = vmul.f32 %v252_v43, %v244_v36 }
 0x223   :  { %v254_v46 = vpack.c.bf16 %v253_v44, %v253_v44 }
 0x225   :  { %802 = vmatmul.mubr.bf16.vlgmr.msra.gmra.mrb[4].mxu0 %v254_v46 }
 0x226   :  { %814 = vmatpush3.bf16.msra.mxu0 %v881_v45  ;;  %829 = vmatprep.mubr.msk.bf16.mxu0 %vm1030_vm0, %v1029_v0 }
 0x227   :  { %815 = vmatprep.subr.bf16.mxu0 %v1029_v0 }
 0x22a   :  { %816 = vmatpush3.bf16.msra.mxu0 %v882_v47 }
 0x22b   :  { %817 = vmatprep.subr.bf16.mxu0 %v1029_v0 }
 0x22e   :  { %818 = vmatpush3.bf16.msra.mxu0 %v883_v52 }
 0x22f   :  { %819 = vmatprep.subr.bf16.mxu0 %v1029_v0 }
 0x232   :  { %820 = vmatpush3.bf16.msra.mxu0 %v884_v53 }
 0x233   :  { %821 = vmatprep.subr.bf16.mxu0 %v1029_v0 }
 0x236   :  { %822 = vmatpush3.bf16.msra.mxu0 %v885_v54 }
 0x237   :  { %823 = vmatprep.subr.bf16.mxu0 %v1029_v0 }
 0x23a   :  { %824 = vmatpush3.bf16.msra.mxu0 %v886_v55 }
 0x23b   :  { %825 = vmatprep.subr.bf16.mxu0 %v1029_v0 }
 0x23e   :  { %826 = vmatpush3.bf16.msra.mxu0 %v887_v56 }
 0x23f   :  { %827 = vmatprep.subr.bf16.mxu0 %v1029_v0  ;;  %v709_v0 = vld [vmem:[%s1194_s5] ss:$0 sm:$0xff] }
 0x242   :  { %828 = vmatpush3.bf16.msra.mxu0 %v888_v57 }
 0x2f8   :  { %v358_v60 = vpop.f32.mrb[4].mxu0 }
 0x2f9   :  { %v415_v62 = vadd.f32 %v414_v48, %v358_v60  ;;  %v803_v63 = vpop.f32.mrb[5].mxu0 }
 0x2fa   :  { %v361_v1 = vpop.f32.mrb[6].mxu0 }
 0x2fb   :  { %v425_v2 = vadd.f32 %v699_v61, %v415_v62  ;;  %v804_v3 = vpop.f32.mrb[7].mxu0 }
 0x2fd   :  { %v426_v4 = vmul.f32 0.5, %v425_v2 }
 0x2ff   :  { %901 = vtanh.f32 %v426_v4 }
 0x309   :  { %v902_v5 = vpop.eup %901 }
 0x30a   :  { %v428_v6 = vmul.f32 0.5, %v902_v5 }
 0x30c   :  { %v429_v7 = vadd.f32 0.5, %v428_v6 }
 0x30e   :  { %v430_v8 = vmul.f32 %v429_v7, %v425_v2 }
 0x310   :  { %v431_v9 = vpack.c.bf16 %v430_v8, %v430_v8 }
 0x312   :  { %830 = vmatmul.mubr.bf16.vlgmr.msra.gmra.mrb[8].mxu0 %v431_v9 }
 0x3e5   :  { %v535_v17 = vpop.f32.mrb[8].mxu0 }
 0x3e6   :  { %v536_v18 = vadd.f32 %v700_v16, %v535_v17  ;;  %v831_v19 = vpop.f32.mrb[9].mxu0 }
 0x3e7   :  { %v538_v20 = vpop.f32.mrb[10].mxu0 }
 0x3e8   :  { %v541_v21 = vmul.f32 0.5, %v536_v18  ;;  %v832_v22 = vpop.f32.mrb[11].mxu0 }
 0x3ea   :  { %903 = vtanh.f32 %v541_v21 }
 0x3f4   :  { %v904_v23 = vpop.eup %903 }
 0x3f5   :  { %v543_v24 = vmul.f32 0.5, %v904_v23 }
 0x3f7   :  { %v544_v25 = vadd.f32 0.5, %v543_v24 }
 0x3f9   :  { %v545_v26 = vmul.f32 %v544_v25, %v536_v18 }
 0x3fb   :  { %v546_v27 = vpack.c.bf16 %v545_v26, %v545_v26 }
 0x3fd   :  { %850 = vmatmul.mubr.bf16.vlgmr.msra.gmra.mrb[8].mxu1 %v546_v27 }
 0x4d0   :  { %v652_v28 = vpop.f32.mrb[8].mxu1 }
 0x4d1   :  { %v653_v29 = vadd.f32 %v709_v0, %v652_v28  ;;  %v851_v30 = vpop.f32.mrb[9].mxu1 }
 0x4d2   :  { %v655_v31 = vpop.f32.mrb[10].mxu1 }
 0x4d3   :  { %658 = vst [vmem:[#allocation10] sm:$0xff] %v653_v29  ;;  %v852_v32 = vpop.f32.mrb[11].mxu1 }
 0x4d4   :  { %1004 = shalt.err (!%p1001_p8)
}
 0x4d5   :  { %s1005_s5 = scalar_lea.hbm %s1195_s6, 128 }
 0x4d6   :  { %p1006_p9 = scmp.ne.s32.totalorder %s1195_s6, %s1005_s5  ;;  %p1009_p10 = scmp.lt.u32.totalorder %s1005_s5, %s1195_s6 }
 0x4d8   :  { %p1011_p11 = pnand %p1009_p10, %p1006_p9 }
 0x4da   :  { %1014 = shalt.err (!%p1011_p11)
}
 0x4db   :  { %668 = dma.vmem_to_hbm [thread:$0]  %s666_s30, 128, %s1195_s6, [#allocation4]  }
 0x4dc   :  { %1021 = dma.done.wait [#allocation4], 128  }
 0x4dd   :  { %1022 = vsyncadd [#allocation4], 4294967168 }
 0x4de   :  { %672 = vsyncpa [#allocation3], 1 }
 0x4df   :  { %673 = vsyncpa [#allocation6], 1 }
 0x4e0   :  { %674 = vsyncpa [#allocation9], 1 }
 0x4e1   :  { %675 = vsyncpa [#allocation4], 1 }

</bundles_post_ra>
